<compile_context>
chip_gen: v6e
topology: v6e:2x2x1
jax: 0.10.0
libtpu: 0.0.40
codegen_flags: <defaults>
</compile_context>

<pallas_src>
import jax
import jax.numpy as jnp
from jax import lax
from jax.experimental import pallas as pl
from jax.experimental.pallas import tpu as pltpu


def _round_up(x: int, m: int) -> int:
    return ((x + m - 1) // m) * m


def _vmem_capacity_bytes() -> int:
    """Physical VMEM of the current TPU generation (conservative fallback)."""
    try:
        return int(pltpu.get_tpu_info().vmem_capacity_bytes)
    except Exception:
        return 64 << 20  # v7x per-TensorCore VMEM (smallest of the targets)


def _patch_embed_kernel(patches_ref, w_ref, b_ref, out_ref):
    # patches_ref: (tm, K) bf16    w_ref: (K, D) bf16    b_ref: (1, D) f32
    # out_ref:     (tm, D) out_dtype
    acc = jnp.dot(patches_ref[...], w_ref[...],
                  preferred_element_type=jnp.float32)
    out_ref[...] = (acc + b_ref[...]).astype(out_ref.dtype)


def patch_embed_matmul(patches, weight, bias, *, tm=2048,
                       compute_dtype=jnp.bfloat16, out_dtype=None):
    """patches: (M, K), weight: (K, D), bias: (D,) -> (M, D) via Pallas matmul.

    No host-side padding: the M grid is ragged (pl.cdiv) and K/D use full-extent
    blocks.  Accumulation is f32; operands are cast to `compute_dtype`.
    """
    M, K = patches.shape
    Kw, D = weight.shape
    assert Kw == K
    out_dtype = out_dtype or patches.dtype

    # ---- row tile selection ------------------------------------------------
    # 128-aligned request, clamped so (a) the parallel M axis keeps >= 2 grid
    # steps when M allows it (v7x megacore), and (b) the block never exceeds the
    # (8-aligned) array extent so every block stays layout-legal.
    tm = max(128, _round_up(int(tm), 128))
    tm = min(tm, max(128, _round_up(pl.cdiv(M, 2), 128)))
    if M <= 8:
        tm = M                      # full-extent block is always legal
    else:
        tm = min(tm, (M // 8) * 8)  # multiple of 8 sublanes, <= M
    grid_m = pl.cdiv(M, tm)

    # ---- operands (no padded copies) ---------------------------------------
    p = patches.astype(compute_dtype)
    w = weight.astype(compute_dtype)
    b = bias.astype(jnp.float32).reshape(1, D)

    in_b = jnp.dtype(compute_dtype).itemsize
    out_b = jnp.dtype(out_dtype).itemsize

    # ---- generation-aware VMEM limit ---------------------------------------
    vmem_bytes = (2 * tm * K * in_b        # double-buffered activation tile
                  + 2 * tm * D * out_b     # double-buffered output tile
                  + 2 * K * D * in_b       # weight (x2 covers fallback buffering)
                  + 2 * D * 4              # bias
                  + (2 << 20))             # compiler scratch headroom
    cap = _vmem_capacity_bytes()
    soft_cap = int(0.7 * cap)
    vmem_limit = max(vmem_bytes, 16 << 20)           # never below the footprint
    if vmem_bytes <= soft_cap:
        vmem_limit = min(vmem_limit, soft_cap)       # prefer <= 70% of physical
    else:
        vmem_limit = min(vmem_limit, cap)            # never above physical

    cost = pl.CostEstimate(
        flops=2 * M * K * D,
        transcendentals=0,
        bytes_accessed=M * K * in_b + K * D * in_b + D * 4 + M * D * out_b,
    )

    def _build(single_buffer_resident):
        if single_buffer_resident:
            # Constant index_map -> no point double-buffering weight / bias.
            w_spec = pl.BlockSpec((K, D), lambda i: (0, 0),
                                  pipeline_mode=pl.Buffered(1))
            b_spec = pl.BlockSpec((1, D), lambda i: (0, 0),
                                  pipeline_mode=pl.Buffered(1))
        else:
            w_spec = pl.BlockSpec((K, D), lambda i: (0, 0))
            b_spec = pl.BlockSpec((1, D), lambda i: (0, 0))
        return pl.pallas_call(
            _patch_embed_kernel,
            out_shape=jax.ShapeDtypeStruct((M, D), out_dtype),
            grid_spec=pltpu.PrefetchScalarGridSpec(
                num_scalar_prefetch=0,
                grid=(grid_m,),
                in_specs=[
                    pl.BlockSpec((tm, K), lambda i: (i, 0)),  # row tile of patches
                    w_spec,                                   # resident weight
                    b_spec,                                   # resident bias
                ],
                out_specs=pl.BlockSpec((tm, D), lambda i: (i, 0)),
            ),
            compiler_params=pltpu.CompilerParams(
                dimension_semantics=("parallel",),
                vmem_limit_bytes=int(vmem_limit),
            ),
            cost_estimate=cost,
        )

    try:
        return _build(True)(p, w, b)
    except Exception:
        # pipeline_mode / Buffered(1) unsupported on this JAX: default buffering.
        return _build(False)(p, w, b)


def patch_embed_forward(x, conv_weight, conv_bias, *, kernel_size, stride,
                        tm=2048, compute_dtype=jnp.bfloat16, out_dtype=None,
                        tokens_out=False):
    """Equivalent of PatchEmbed.forward (Conv2d with stride == kernel_size, padding=0).

    x:           (B, C, H, W)            -- NCHW, like PyTorch
    conv_weight: (embed_dim, C, k, k)    -- PyTorch Conv2d weight layout
    conv_bias:   (embed_dim,)
    returns:     (B, embed_dim, H//k, W//k)       if tokens_out=False (default)
                 (B, (H//k)*(W//k), embed_dim)    if tokens_out=True
    """
    assert kernel_size == stride, "PatchEmbed uses stride == kernel_size"
    B, C, H, W = x.shape
    D, Cw, k, k2 = conv_weight.shape
    assert (Cw, k, k2) == (C, kernel_size, kernel_size)
    assert H % k == 0 and W % k == 0
    Hp, Wp = H // k, W // k
    out_dtype = out_dtype or x.dtype

    # --- glue: patchify in bf16 (half the HBM traffic of this XLA transpose) ---
    xc = x.astype(compute_dtype)
    patches = xc.reshape(B, C, Hp, k, Wp, k).transpose(0, 2, 4, 1, 3, 5)
    patches = patches.reshape(B * Hp * Wp, C * k * k)          # (M, K)

    # conv weight -> dense projection matrix (K, D)
    w_mat = conv_weight.reshape(D, C * k * k).T

    # --- hot path: bf16 MXU matmul + f32 accumulation + bias in Pallas ---
    out = patch_embed_matmul(patches, w_mat, conv_bias, tm=tm,
                             compute_dtype=compute_dtype,
                             out_dtype=out_dtype)               # (M, D)

    if tokens_out:
        return out.reshape(B, Hp * Wp, D)                       # (B, N, D)
    # --- glue: back to NCHW conv output layout (matches torch Conv2d) ---
    return out.reshape(B, Hp, Wp, D).transpose(0, 3, 1, 2)      # (B, D, Hp, Wp)


if __name__ == "__main__":
    # Small shapes consistent with the module (defaults scaled down).
    B, C, H, W = 2, 4, 16, 16
    kernel_size = stride = 8
    embed_dim = 32

    key = jax.random.PRNGKey(0)
    kx, kw, kb = jax.random.split(key, 3)

    x = jax.random.normal(kx, (B, C, H, W), dtype=jnp.float32)
    fan_in = C * kernel_size * kernel_size
    conv_weight = jax.random.normal(kw, (embed_dim, C, kernel_size, kernel_size),
                                    dtype=jnp.float32) * (fan_in ** -0.5)
    conv_bias = jax.random.normal(kb, (embed_dim,), dtype=jnp.float32) * 0.01

    out = patch_embed_forward(x, conv_weight, conv_bias,
                              kernel_size=kernel_size, stride=stride)
    out = jax.block_until_ready(out)

    # Cross-check against XLA's f32 conv (same semantics as torch.nn.Conv2d).
    # Tolerance accounts for bf16 MXU inputs (f32 accumulation preserved).
    ref = lax.conv_general_dilated(
        x, conv_weight,
        window_strides=(stride, stride),
        padding="VALID",
        dimension_numbers=("NCHW", "OIHW", "NCHW"),
    ) + conv_bias.reshape(1, embed_dim, 1, 1)

    Hp, Wp = H // kernel_size, W // kernel_size
    assert out.shape == (B, embed_dim, Hp, Wp)
    assert out.dtype == x.dtype
    assert jnp.allclose(out, ref, atol=5e-2, rtol=5e-2), (
        float(jnp.max(jnp.abs(out - ref))))

    # Token-layout fast path (skips the NCHW round-trip); same compiled kernel.
    tokens = patch_embed_forward(x, conv_weight, conv_bias,
                                 kernel_size=kernel_size, stride=stride,
                                 tokens_out=True)
    tokens = jax.block_until_ready(tokens)
    assert tokens.shape == (B, Hp * Wp, embed_dim)
    assert jnp.allclose(
        tokens.reshape(B, Hp, Wp, embed_dim).transpose(0, 3, 1, 2), out,
        atol=1e-6, rtol=1e-6)

    print("KERNEL_OK")
</pallas_src>

<mosaic_0001>
module attributes {stable_mosaic.version = 11 : i64} {
  func.func @_patch_embed_kernel(%arg0: i32, %arg1: memref<8x256xbf16, #tpu.memory_space<vmem>>, %arg2: memref<256x32xbf16, #tpu.memory_space<vmem>>, %arg3: memref<1x32xf32, #tpu.memory_space<vmem>>, %arg4: memref<8x32xf32, #tpu.memory_space<vmem>>) attributes {dimension_semantics = [#tpu.dimension_semantics<parallel>], iteration_bounds = array<i64: 1>, scalar_prefetch = 0 : i64, scratch_operands = 0 : i64, tpu.core_type = #tpu.core_type<tc>, window_params = [{transform_indices = @transform_0, window_bounds = array<i64: 8, 256>}, {pipeline_mode = #tpu.pipeline_mode<synchronous>, transform_indices = @transform_1, window_bounds = array<i64: 256, 32>}, {pipeline_mode = #tpu.pipeline_mode<synchronous>, transform_indices = @transform_2, window_bounds = array<i64: 1, 32>}, {transform_indices = @transform_3, window_bounds = array<i64: 8, 32>}]} {
    %c0 = arith.constant 0 : index
    %c0_0 = arith.constant 0 : index
    %0 = vector.load %arg1[%c0, %c0_0] : memref<8x256xbf16, #tpu.memory_space<vmem>>, vector<8x256xbf16>
    %c0_1 = arith.constant 0 : index
    %c0_2 = arith.constant 0 : index
    %1 = vector.load %arg2[%c0_1, %c0_2] : memref<256x32xbf16, #tpu.memory_space<vmem>>, vector<256x32xbf16>
    %cst = arith.constant dense<0.000000e+00> : vector<8x32xf32>
    %2 = tpu.matmul %0, %1, %cst {dimension_numbers = #tpu.dot_dimension_numbers<[1], [0], [0], [1], [0, 0, 1, 1], [], []>} : vector<8x256xbf16>, vector<256x32xbf16>, vector<8x32xf32> -> vector<8x32xf32>
    %c0_3 = arith.constant 0 : index
    %c0_4 = arith.constant 0 : index
    %3 = vector.load %arg3[%c0_3, %c0_4] : memref<1x32xf32, #tpu.memory_space<vmem>>, vector<1x32xf32>
    %4 = vector.broadcast %3 : vector<1x32xf32> to vector<8x32xf32>
    %5 = arith.addf %2, %4 : vector<8x32xf32>
    %c0_5 = arith.constant 0 : index
    %c0_6 = arith.constant 0 : index
    %6 = vector.load %arg4[%c0_5, %c0_6] : memref<8x32xf32, #tpu.memory_space<vmem>>, vector<8x32xf32>
    tpu.vector_store %arg4[%c0_5, %c0_6], %5 {strides = array<i32>} : memref<8x32xf32, #tpu.memory_space<vmem>>, vector<8x32xf32>,
    return
  }
  func.func @transform_0(%arg0: i32) -> (i32, i32) {
    %c0_i32 = arith.constant 0 : i32
    %c0_i32_0 = arith.constant 0 : i32
    return %arg0, %c0_i32 : i32, i32
  }
  func.func @transform_1(%arg0: i32) -> (i32, i32) {
    %c0_i32 = arith.constant 0 : i32
    %c0_i32_0 = arith.constant 0 : i32
    %c0_i32_1 = arith.constant 0 : i32
    return %c0_i32, %c0_i32_0 : i32, i32
  }
  func.func @transform_2(%arg0: i32) -> (i32, i32) {
    %c0_i32 = arith.constant 0 : i32
    %c0_i32_0 = arith.constant 0 : i32
    %c0_i32_1 = arith.constant 0 : i32
    return %c0_i32, %c0_i32_0 : i32, i32
  }
  func.func @transform_3(%arg0: i32) -> (i32, i32) {
    %c0_i32 = arith.constant 0 : i32
    %c0_i32_0 = arith.constant 0 : i32
    return %arg0, %c0_i32 : i32, i32
  }
}

module attributes {stable_mosaic.version = 11 : i64} {
  func.func @_patch_embed_kernel(%arg0: i32, %arg1: memref<8x256xbf16, #tpu.memory_space<vmem>>, %arg2: memref<256x32xbf16, #tpu.memory_space<vmem>>, %arg3: memref<1x32xf32, #tpu.memory_space<vmem>>, %arg4: memref<8x32xf32, #tpu.memory_space<vmem>>) attributes {dimension_semantics = [#tpu.dimension_semantics<parallel>], iteration_bounds = array<i64: 1>, scalar_prefetch = 0 : i64, scratch_operands = 0 : i64, tpu.core_type = #tpu.core_type<tc>, window_params = [{transform_indices = @transform_0, window_bounds = array<i64: 8, 256>}, {pipeline_mode = #tpu.pipeline_mode<synchronous>, transform_indices = @transform_1, window_bounds = array<i64: 256, 32>}, {pipeline_mode = #tpu.pipeline_mode<synchronous>, transform_indices = @transform_2, window_bounds = array<i64: 1, 32>}, {transform_indices = @transform_3, window_bounds = array<i64: 8, 32>}]} {
    %c0 = arith.constant 0 : index
    %c0_0 = arith.constant 0 : index
    %0 = vector.load %arg1[%c0, %c0_0] : memref<8x256xbf16, #tpu.memory_space<vmem>>, vector<8x256xbf16>
    %c0_1 = arith.constant 0 : index
    %c0_2 = arith.constant 0 : index
    %1 = vector.load %arg2[%c0_1, %c0_2] : memref<256x32xbf16, #tpu.memory_space<vmem>>, vector<256x32xbf16>
    %cst = arith.constant dense<0.000000e+00> : vector<8x32xf32>
    %2 = tpu.matmul %0, %1, %cst {dimension_numbers = #tpu.dot_dimension_numbers<[1], [0], [0], [1], [0, 0, 1, 1], [], []>} : vector<8x256xbf16>, vector<256x32xbf16>, vector<8x32xf32> -> vector<8x32xf32>
    %c0_3 = arith.constant 0 : index
    %c0_4 = arith.constant 0 : index
    %3 = vector.load %arg3[%c0_3, %c0_4] : memref<1x32xf32, #tpu.memory_space<vmem>>, vector<1x32xf32>
    %4 = vector.broadcast %3 : vector<1x32xf32> to vector<8x32xf32>
    %5 = arith.addf %2, %4 : vector<8x32xf32>
    %c0_5 = arith.constant 0 : index
    %c0_6 = arith.constant 0 : index
    %6 = vector.load %arg4[%c0_5, %c0_6] : memref<8x32xf32, #tpu.memory_space<vmem>>, vector<8x32xf32>
    tpu.vector_store %arg4[%c0_5, %c0_6], %5 {strides = array<i32>} : memref<8x32xf32, #tpu.memory_space<vmem>>, vector<8x32xf32>,
    return
  }
  func.func @transform_0(%arg0: i32) -> (i32, i32) {
    %c0_i32 = arith.constant 0 : i32
    %c0_i32_0 = arith.constant 0 : i32
    return %arg0, %c0_i32 : i32, i32
  }
  func.func @transform_1(%arg0: i32) -> (i32, i32) {
    %c0_i32 = arith.constant 0 : i32
    %c0_i32_0 = arith.constant 0 : i32
    %c0_i32_1 = arith.constant 0 : i32
    return %c0_i32, %c0_i32_0 : i32, i32
  }
  func.func @transform_2(%arg0: i32) -> (i32, i32) {
    %c0_i32 = arith.constant 0 : i32
    %c0_i32_0 = arith.constant 0 : i32
    %c0_i32_1 = arith.constant 0 : i32
    return %c0_i32, %c0_i32_0 : i32, i32
  }
  func.func @transform_3(%arg0: i32) -> (i32, i32) {
    %c0_i32 = arith.constant 0 : i32
    %c0_i32_0 = arith.constant 0 : i32
    return %arg0, %c0_i32 : i32, i32
  }
}

</mosaic_0001>

<bundles_post_ra>
// kernel: tpu_custom_call.1
= control target key start
LH: loop header
LB: loop body
LE: loop exit
PB: predicated region body
PF: predicated region fallthrough
CT: control target
= control target key end

     0   :  { %s375_s0 = inlined_call_operand.vmem [shape: bf16[8,256], index: 0, kind: input, shape index: {}]   ;;  %s376_s1 = inlined_call_operand.vmem [shape: bf16[256,32], index: 1, kind: input, shape index: {}]   ;;  %s377_s2 = inlined_call_operand.vmem [shape: f32[1,32], index: 2, kind: input, shape index: {}]   ;;  %s378_s3 = inlined_call_operand.hbm [shape: f32[8,32], index: 3, kind: output, shape index: {}]  }
   0x1   :  { %v257_v0 = vld [vmem:[%s376_s1 + $0x78] sm:$0xff]   ;;  %v259_v2 = vld [vmem:[%s376_s1 + $0x70] sm:$0xff]   ;;  %v261_v4 = vld [vmem:[%s376_s1 + $0x68] sm:$0xff]  }
   0x2   :  { %v258_v1 = vld [vmem:[%s376_s1 + $0x38] sm:$0xff]   ;;  %234 = vmatprep.subr.bf16.mxu0 %v257_v0  ;;  %v260_v3 = vld [vmem:[%s376_s1 + $0x30] sm:$0xff]   ;;  %v262_v5 = vld [vmem:[%s376_s1 + $0x28] sm:$0xff]  }
   0x3   :  { %235 = vmatpush3.bf16.msra.mxu0 %v258_v1  ;;  %v263_v6 = vld [vmem:[%s376_s1 + $0x60] sm:$0xff]   ;;  %v265_v8 = vld [vmem:[%s376_s1 + $0x58] sm:$0xff]   ;;  %v267_v10 = vld [vmem:[%s376_s1 + $0x50] sm:$0xff]  }
   0x4   :  { %236 = vmatprep.subr.bf16.mxu0 %v259_v2  ;;  %v264_v7 = vld [vmem:[%s376_s1 + $0x20] sm:$0xff]   ;;  %v266_v9 = vld [vmem:[%s376_s1 + $0x18] sm:$0xff]  }
   0x5   :  { %v16_v11 = vld [vmem:[%s375_s0] sm:$0xff] }
   0x7   :  { %237 = vmatpush3.bf16.msra.mxu0 %v260_v3 }
   0x8   :  { %238 = vmatprep.subr.bf16.mxu0 %v261_v4 }
   0xb   :  { %239 = vmatpush3.bf16.msra.mxu0 %v262_v5 }
   0xc   :  { %240 = vmatprep.subr.bf16.mxu0 %v263_v6 }
   0xf   :  { %241 = vmatpush3.bf16.msra.mxu0 %v264_v7 }
  0x10   :  { %242 = vmatprep.subr.bf16.mxu0 %v265_v8 }
  0x11   :  { %8 = vsyncpa [#allocation3], 0  ;;  %v217_v12 = vcombine.high %v16_v11, %v16_v11  ;;  %v268_v13 = vld [vmem:[%s376_s1 + $0x10] sm:$0xff]   ;;  %v269_v14 = vld [vmem:[%s376_s1 + $0x48] sm:$0xff]   ;;  %v216_v18 = vcombine.low %v16_v11, %v16_v11  ;;  %s297_s20 = smov [#allocation2]   ;;  %vm199_vm0 = vcmask 261120  }
  0x12   :  { %v270_v15 = vld [vmem:[%s376_s1 + $0x8] sm:$0xff]   ;;  %v271_v16 = vld [vmem:[%s376_s1 + $0x40] sm:$0xff]   ;;  %s207_s21 = sshll.u32 %s297_s20, 4  ;;  %s208_s21 = int_to_ptr.vmem [resolvable:$true] %s207_s21 }
  0x13   :  { %243 = vmatpush3.bf16.msra.mxu0 %v266_v9  ;;  %191 = vmatprep.mubr.bf16.mxu0 %v217_v12  ;;  %v272_v17 = vld [vmem:[%s376_s1] sm:$0xff]   ;;  %s275_s1 = scalar_lea.vmem %s208_s21, 128  ;;  %p280_p1 = scmp.lt.s32.totalorder %s208_s21, %s208_s21 }
  0x14   :  { %244 = vmatprep.subr.bf16.mxu0 %v267_v10  ;;  %v215_v20 = vld [vmem:[%s377_s2] ss:$0 sm:$0xff]  ;;  %p276_p0 = scmp.ne.s32.totalorder %s208_s21, %s275_s1  ;;  %p281_p2 = scmp.lt.s32.totalorder %s275_s1, %s275_s1 }
  0x16   :  { %p282_p3 = por %p281_p2, %p280_p1 }
  0x17   :  { %245 = vmatpush3.bf16.msra.mxu0 %v268_v13 }
  0x18   :  { %246 = vmatprep.subr.bf16.mxu0 %v269_v14  ;;  %p283_p4 = pnand %p282_p3, %p276_p0 }
  0x1b   :  { %247 = vmatpush3.bf16.msra.mxu0 %v270_v15 }
  0x1c   :  { %248 = vmatprep.subr.bf16.mxu0 %v271_v16 }
  0x1f   :  { %249 = vmatpush3.bf16.msra.mxu0 %v272_v17 }
  0x22   :  { %192 = vmatmul.mubr.bf16.vlgmr.msra.gmra.mxu0 %v216_v18 }
  0xe2   :  { %v250_v19 = vpop.f32.mrf.mxu0 }
  0xe4   :  { %v251_v21 = vpop.f32.mrf.mxu0 }
  0xe5   :  { %v252_v22 = vadd.f32 %v251_v21, %v250_v19 }
  0xe6   :  { %v253_v23 = vpop.f32.mrf.mxu0 }
  0xe7   :  { %v194_v24 = vadd.f32 %v252_v22, %v215_v20 }
  0xe8   :  { %v254_v25 = vpop.f32.mrf.mxu0 }
  0xe9   :  { %200 = vst.msk [vmem:[#allocation2] sm:$0xff] %vm199_vm0, %v194_v24 }
  0xea   :  { %286 = shalt.err (!%p283_p4)
}
  0xeb   :  { %210 = dma.vmem_to_hbm [thread:$0]  %s208_s21, 128, %s378_s3, [#allocation3]  }
  0xec   :  { %295 = dma.done.wait [#allocation3], 128  }
  0xed   :  { %296 = vsyncadd [#allocation3], 4294967168 }
  0xee   :  { %214 = vsyncpa [#allocation3], 1 }

// kernel: tpu_custom_call.1
= control target key start
LH: loop header
LB: loop body
LE: loop exit
PB: predicated region body
PF: predicated region fallthrough
CT: control target
= control target key end

     0   :  { %s375_s0 = inlined_call_operand.vmem [shape: bf16[8,256], index: 0, kind: input, shape index: {}]   ;;  %s376_s1 = inlined_call_operand.vmem [shape: bf16[256,32], index: 1, kind: input, shape index: {}]   ;;  %s377_s2 = inlined_call_operand.vmem [shape: f32[1,32], index: 2, kind: input, shape index: {}]   ;;  %s378_s3 = inlined_call_operand.hbm [shape: f32[8,32], index: 3, kind: output, shape index: {}]  }
   0x1   :  { %v257_v0 = vld [vmem:[%s376_s1 + $0x78] sm:$0xff]   ;;  %v259_v2 = vld [vmem:[%s376_s1 + $0x70] sm:$0xff]   ;;  %v261_v4 = vld [vmem:[%s376_s1 + $0x68] sm:$0xff]  }
   0x2   :  { %v258_v1 = vld [vmem:[%s376_s1 + $0x38] sm:$0xff]   ;;  %234 = vmatprep.subr.bf16.mxu0 %v257_v0  ;;  %v260_v3 = vld [vmem:[%s376_s1 + $0x30] sm:$0xff]   ;;  %v262_v5 = vld [vmem:[%s376_s1 + $0x28] sm:$0xff]  }
   0x3   :  { %235 = vmatpush3.bf16.msra.mxu0 %v258_v1  ;;  %v263_v6 = vld [vmem:[%s376_s1 + $0x60] sm:$0xff]   ;;  %v265_v8 = vld [vmem:[%s376_s1 + $0x58] sm:$0xff]   ;;  %v267_v10 = vld [vmem:[%s376_s1 + $0x50] sm:$0xff]  }
   0x4   :  { %236 = vmatprep.subr.bf16.mxu0 %v259_v2  ;;  %v264_v7 = vld [vmem:[%s376_s1 + $0x20] sm:$0xff]   ;;  %v266_v9 = vld [vmem:[%s376_s1 + $0x18] sm:$0xff]  }
   0x5   :  { %v16_v11 = vld [vmem:[%s375_s0] sm:$0xff] }
   0x7   :  { %237 = vmatpush3.bf16.msra.mxu0 %v260_v3 }
   0x8   :  { %238 = vmatprep.subr.bf16.mxu0 %v261_v4 }
   0xb   :  { %239 = vmatpush3.bf16.msra.mxu0 %v262_v5 }
   0xc   :  { %240 = vmatprep.subr.bf16.mxu0 %v263_v6 }
   0xf   :  { %241 = vmatpush3.bf16.msra.mxu0 %v264_v7 }
  0x10   :  { %242 = vmatprep.subr.bf16.mxu0 %v265_v8 }
  0x11   :  { %8 = vsyncpa [#allocation3], 0  ;;  %v217_v12 = vcombine.high %v16_v11, %v16_v11  ;;  %v268_v13 = vld [vmem:[%s376_s1 + $0x10] sm:$0xff]   ;;  %v269_v14 = vld [vmem:[%s376_s1 + $0x48] sm:$0xff]   ;;  %v216_v18 = vcombine.low %v16_v11, %v16_v11  ;;  %s297_s20 = smov [#allocation2]   ;;  %vm199_vm0 = vcmask 261120  }
  0x12   :  { %v270_v15 = vld [vmem:[%s376_s1 + $0x8] sm:$0xff]   ;;  %v271_v16 = vld [vmem:[%s376_s1 + $0x40] sm:$0xff]   ;;  %s207_s21 = sshll.u32 %s297_s20, 4  ;;  %s208_s21 = int_to_ptr.vmem [resolvable:$true] %s207_s21 }
  0x13   :  { %243 = vmatpush3.bf16.msra.mxu0 %v266_v9  ;;  %191 = vmatprep.mubr.bf16.mxu0 %v217_v12  ;;  %v272_v17 = vld [vmem:[%s376_s1] sm:$0xff]   ;;  %s275_s1 = scalar_lea.vmem %s208_s21, 128  ;;  %p280_p1 = scmp.lt.s32.totalorder %s208_s21, %s208_s21 }
  0x14   :  { %244 = vmatprep.subr.bf16.mxu0 %v267_v10  ;;  %v215_v20 = vld [vmem:[%s377_s2] ss:$0 sm:$0xff]  ;;  %p276_p0 = scmp.ne.s32.totalorder %s208_s21, %s275_s1  ;;  %p281_p2 = scmp.lt.s32.totalorder %s275_s1, %s275_s1 }
  0x16   :  { %p282_p3 = por %p281_p2, %p280_p1 }
  0x17   :  { %245 = vmatpush3.bf16.msra.mxu0 %v268_v13 }
  0x18   :  { %246 = vmatprep.subr.bf16.mxu0 %v269_v14  ;;  %p283_p4 = pnand %p282_p3, %p276_p0 }
  0x1b   :  { %247 = vmatpush3.bf16.msra.mxu0 %v270_v15 }
  0x1c   :  { %248 = vmatprep.subr.bf16.mxu0 %v271_v16 }
  0x1f   :  { %249 = vmatpush3.bf16.msra.mxu0 %v272_v17 }
  0x22   :  { %192 = vmatmul.mubr.bf16.vlgmr.msra.gmra.mxu0 %v216_v18 }
  0xe2   :  { %v250_v19 = vpop.f32.mrf.mxu0 }
  0xe4   :  { %v251_v21 = vpop.f32.mrf.mxu0 }
  0xe5   :  { %v252_v22 = vadd.f32 %v251_v21, %v250_v19 }
  0xe6   :  { %v253_v23 = vpop.f32.mrf.mxu0 }
  0xe7   :  { %v194_v24 = vadd.f32 %v252_v22, %v215_v20 }
  0xe8   :  { %v254_v25 = vpop.f32.mrf.mxu0 }
  0xe9   :  { %200 = vst.msk [vmem:[#allocation2] sm:$0xff] %vm199_vm0, %v194_v24 }
  0xea   :  { %286 = shalt.err (!%p283_p4)
}
  0xeb   :  { %210 = dma.vmem_to_hbm [thread:$0]  %s208_s21, 128, %s378_s3, [#allocation3]  }
  0xec   :  { %295 = dma.done.wait [#allocation3], 128  }
  0xed   :  { %296 = vsyncadd [#allocation3], 4294967168 }
  0xee   :  { %214 = vsyncpa [#allocation3], 1 }

</bundles_post_ra>
